<compile_context>
chip_gen: v5e
topology: v5e:2x2
jax: 0.10.0
libtpu: 0.0.40
codegen_flags: <defaults>
</compile_context>

<pallas_src>
import jax
import jax.numpy as jnp
from jax.experimental import pallas as pl
from jax.experimental.pallas import tpu as pltpu

_LANE = 128
_PACK = 16  # bf16 packs 16 rows per vreg; round batch tiles / padding to this.


def _round_up(n, m):
    return ((n + m - 1) // m) * m


def _cdiv(a, b):
    return (a + b - 1) // b


def _physical_vmem_bytes():
    try:
        return int(pltpu.get_tpu_info().vmem_capacity_bytes)
    except Exception:
        return 64 << 20  # conservative default (v7x per-TensorCore VMEM)


def _const_param_spec(shape, single_buffer):
    """Resident (constant index_map) parameter block; single-buffered when supported."""
    if single_buffer and hasattr(pl, "Buffered"):
        try:
            return pl.BlockSpec(shape, lambda i: (0, 0), pipeline_mode=pl.Buffered(1))
        except TypeError:
            pass
    return pl.BlockSpec(shape, lambda i: (0, 0))


def _make_mlp_kernel(n_hidden, out_size, pad_out, compute_dtype):
    """Kernel ref order: x, (wT_0, b_0, ..., wT_out, b_out), out."""
    n_layers = n_hidden + 1

    def kernel(*refs):
        x_ref = refs[0]
        param_refs = refs[1:1 + 2 * n_layers]
        o_ref = refs[1 + 2 * n_layers]

        h = x_ref[...]  # (tile_b, pad_in) compute_dtype (bf16)

        # Hidden layers: Linear -> ReLU (dropout == identity in eval mode).
        for i in range(n_hidden):
            w = param_refs[2 * i][...]        # (pad_in_i, pad_out_i) bf16
            b = param_refs[2 * i + 1][...]    # (1, pad_out_i) f32
            acc = jnp.dot(h, w, preferred_element_type=jnp.float32)
            a = jnp.maximum(acc + b, 0.0)     # f32 elementwise (portable across v5e)
            h = a.astype(compute_dtype)       # bf16 value feeds the next MXU op

        # Output layer.
        w = param_refs[2 * n_hidden][...]
        b = param_refs[2 * n_hidden + 1][...]
        z = jnp.dot(h, w, preferred_element_type=jnp.float32) + b  # (tile_b, pad_out) f32

        # Padded logit lanes must not contribute to the normalizer.
        if out_size < pad_out:
            lane = jax.lax.broadcasted_iota(jnp.int32, z.shape, 1)
            z = jnp.where(lane < out_size, z, -jnp.inf)

        # Numerically stable log_softmax along the feature axis.
        m = jnp.max(z, axis=1, keepdims=True)
        zs = z - m
        lse = jnp.log(jnp.sum(jnp.exp(zs), axis=1, keepdims=True))
        o_ref[...] = zs - lse

    return kernel


def pack_params(params, *, compute_dtype=jnp.bfloat16):
    """One-time packing: pad feature dims to 128, transpose to (in,out), cast to bf16."""
    in_features = int(params[0][0].shape[1])
    out_size = int(params[-1][0].shape[0])
    pad_in = _round_up(in_features, _LANE)

    flat, widths = [], []
    prev_pad = pad_in
    for w, b in params:
        w = jnp.asarray(w, jnp.float32)
        b = jnp.asarray(b, jnp.float32)
        out_f, in_f = w.shape
        pad_o = _round_up(out_f, _LANE)
        w_t = jnp.zeros((prev_pad, pad_o), compute_dtype)
        w_t = w_t.at[:in_f, :out_f].set(w.T.astype(compute_dtype))     # zero-padded
        b_p = jnp.zeros((1, pad_o), jnp.float32).at[0, :out_f].set(b)  # zero-padded bias
        flat += [w_t, b_p]
        widths.append(pad_o)
        prev_pad = pad_o

    meta = dict(in_features=in_features, out_size=out_size, pad_in=pad_in,
                padded_widths=tuple(widths))
    return tuple(flat), meta


def _choose_tiling(batch, pad_in, padded_widths, param_bytes, max_tile_b, single_buffer):
    """Pick tile_b from the VMEM budget, minimizing batch padding; >=2 steps when possible."""
    pad_out = padded_widths[-1]
    vmem_phys = _physical_vmem_bytes()
    resident = param_bytes if single_buffer else 2 * param_bytes
    budget = int(vmem_phys * 0.85) - resident
    # Per-row bytes: double-buffered bf16 x tile, double-buffered f32 out tile,
    # plus in-flight f32 accumulators + bf16 activation values per layer.
    per_row = 2 * pad_in * 2 + 2 * pad_out * 4 + sum(padded_widths) * 6
    rows_fit = max(budget // max(per_row, 1), _PACK)
    cap = min(max_tile_b, rows_fit)
    cap = max(_PACK, (cap // _PACK) * _PACK)

    n_tiles = _cdiv(batch, cap)
    if n_tiles < 2 and batch > _PACK:   # v7x: keep both TensorCores busy when possible
        n_tiles = 2
    tile_b = _round_up(_cdiv(batch, n_tiles), _PACK)
    padded_batch = _round_up(batch, tile_b)
    return tile_b, padded_batch


def _mlp_forward_impl(x, flat_inputs, *, meta, compute_dtype, max_tile_b, single_buffer):
    n_layers = len(flat_inputs) // 2
    n_hidden = n_layers - 1
    batch = x.shape[0]
    in_features = meta["in_features"]
    out_size = meta["out_size"]
    pad_in = meta["pad_in"]
    padded_widths = meta["padded_widths"]
    pad_out = padded_widths[-1]

    param_bytes = sum(int(a.size) * a.dtype.itemsize for a in flat_inputs)
    tile_b, padded_batch = _choose_tiling(batch, pad_in, padded_widths, param_bytes,
                                          max_tile_b, single_buffer)

    # Stream the input tile in bf16 (halves x HBM->VMEM traffic). Padded rows/lanes are 0.
    x_p = jnp.zeros((padded_batch, pad_in), compute_dtype)
    x_p = x_p.at[:batch, :in_features].set(jnp.asarray(x).astype(compute_dtype))

    grid = (padded_batch // tile_b,)
    in_specs = [pl.BlockSpec((tile_b, pad_in), lambda i: (i, 0))]
    for arr in flat_inputs:
        in_specs.append(_const_param_spec(arr.shape, single_buffer))
    out_specs = pl.BlockSpec((tile_b, pad_out), lambda i: (i, 0))

    # VMEM budget / limit (capped below physical per-core VMEM -> safe on v7x).
    x_tile_bytes = tile_b * pad_in * 2
    out_tile_bytes = tile_b * pad_out * 4
    act_bytes = tile_b * sum(padded_widths) * 6
    resident_params = param_bytes if single_buffer else 2 * param_bytes
    vmem_needed = resident_params + 2 * (x_tile_bytes + out_tile_bytes) + act_bytes
    vmem_phys = _physical_vmem_bytes()
    vmem_limit = int(min(max(vmem_needed + (4 << 20), 32 << 20), int(vmem_phys * 0.9)))

    flops = 2 * padded_batch * sum(
        int(flat_inputs[2 * i].shape[0]) * int(flat_inputs[2 * i].shape[1])
        for i in range(n_layers))
    cost = pl.CostEstimate(
        flops=flops,
        transcendentals=int(padded_batch * pad_out),
        bytes_accessed=int(x_p.size * x_p.dtype.itemsize + param_bytes
                           + padded_batch * pad_out * 4))

    kernel = _make_mlp_kernel(n_hidden, out_size, pad_out, compute_dtype)

    out_padded = pl.pallas_call(
        kernel,
        out_shape=jax.ShapeDtypeStruct((padded_batch, pad_out), jnp.float32),
        grid=grid,
        in_specs=in_specs,
        out_specs=out_specs,
        compiler_params=pltpu.CompilerParams(
            dimension_semantics=("parallel",),
            vmem_limit_bytes=vmem_limit),
        cost_estimate=cost,
    )(x_p, *flat_inputs)

    return out_padded[:batch, :out_size]


def build_mlp_forward(params, *, compute_dtype=jnp.bfloat16, max_tile_b=2048,
                      single_buffer_params=True):
    """Pre-pack parameters once and return a jitted `forward(x) -> log_probs` callable."""
    flat_inputs, meta = pack_params(params, compute_dtype=compute_dtype)

    @jax.jit
    def forward(x, *flat):
        return _mlp_forward_impl(x, flat, meta=meta, compute_dtype=compute_dtype,
                                 max_tile_b=max_tile_b,
                                 single_buffer=single_buffer_params)

    return lambda x: forward(x, *flat_inputs)


def init_params(key, input_size, output_size, hidden_layers):
    """Deterministic PyTorch-like init: U(-1/sqrt(fan_in), 1/sqrt(fan_in))."""
    sizes = [input_size] + list(hidden_layers) + [output_size]
    params = []
    for fan_in, fan_out in zip(sizes[:-1], sizes[1:]):
        key, kw, kb = jax.random.split(key, 3)
        bound = 1.0 / float(fan_in) ** 0.5
        w = jax.random.uniform(kw, (fan_out, fan_in), jnp.float32, -bound, bound)
        b = jax.random.uniform(kb, (fan_out,), jnp.float32, -bound, bound)
        params.append((w, b))
    return params


def mlp_forward_ref(x, params, *, compute_dtype=jnp.bfloat16):
    """Pure-JAX reference using the same bf16-weight / f32-accumulate recipe."""
    h = jnp.asarray(x, jnp.float32).astype(compute_dtype)
    for w, b in params[:-1]:
        wt = jnp.asarray(w, jnp.float32).T.astype(compute_dtype)
        acc = jnp.dot(h, wt, preferred_element_type=jnp.float32)
        h = jnp.maximum(acc + jnp.asarray(b, jnp.float32), 0.0).astype(compute_dtype)
    w, b = params[-1]
    wt = jnp.asarray(w, jnp.float32).T.astype(compute_dtype)
    z = jnp.dot(h, wt, preferred_element_type=jnp.float32)
    z = z + jnp.asarray(b, jnp.float32)
    return jax.nn.log_softmax(z, axis=1)


if __name__ == "__main__":
    # Small shapes consistent with the module.
    batch = 8
    input_size = 32
    hidden_layers = [64, 32]
    output_size = 16

    key = jax.random.PRNGKey(0)
    key, kx = jax.random.split(key)
    x = jax.random.normal(kx, (batch, input_size), jnp.float32)
    params = init_params(key, input_size, output_size, hidden_layers)

    try:
        fwd = build_mlp_forward(params)
        out = jax.block_until_ready(fwd(x))
    except Exception:
        # Fallback: identical kernel with default (double-buffered) parameter specs.
        fwd = build_mlp_forward(params, single_buffer_params=False)
        out = jax.block_until_ready(fwd(x))

    ref = mlp_forward_ref(x, params)
    assert out.shape == (batch, output_size)
    assert jnp.allclose(out, ref, atol=2e-4, rtol=2e-4), "mismatch vs reference"

    print("KERNEL_OK")
</pallas_src>

<mosaic_0001>
module attributes {stable_mosaic.version = 11 : i64} {
  func.func @kernel(%arg0: i32, %arg1: memref<16x128xbf16, #tpu.memory_space<vmem>>, %arg2: memref<128x128xbf16, #tpu.memory_space<vmem>>, %arg3: memref<1x128xf32, #tpu.memory_space<vmem>>, %arg4: memref<128x128xbf16, #tpu.memory_space<vmem>>, %arg5: memref<1x128xf32, #tpu.memory_space<vmem>>, %arg6: memref<128x128xbf16, #tpu.memory_space<vmem>>, %arg7: memref<1x128xf32, #tpu.memory_space<vmem>>, %arg8: memref<16x128xf32, #tpu.memory_space<vmem>>) attributes {dimension_semantics = [#tpu.dimension_semantics<parallel>], iteration_bounds = array<i64: 1>, scalar_prefetch = 0 : i64, scratch_operands = 0 : i64, tpu.core_type = #tpu.core_type<tc>, window_params = [{transform_indices = @transform_0, window_bounds = array<i64: 16, 128>}, {pipeline_mode = #tpu.pipeline_mode<synchronous>, transform_indices = @transform_1, window_bounds = array<i64: 128, 128>}, {pipeline_mode = #tpu.pipeline_mode<synchronous>, transform_indices = @transform_2, window_bounds = array<i64: 1, 128>}, {pipeline_mode = #tpu.pipeline_mode<synchronous>, transform_indices = @transform_3, window_bounds = array<i64: 128, 128>}, {pipeline_mode = #tpu.pipeline_mode<synchronous>, transform_indices = @transform_4, window_bounds = array<i64: 1, 128>}, {pipeline_mode = #tpu.pipeline_mode<synchronous>, transform_indices = @transform_5, window_bounds = array<i64: 128, 128>}, {pipeline_mode = #tpu.pipeline_mode<synchronous>, transform_indices = @transform_6, window_bounds = array<i64: 1, 128>}, {transform_indices = @transform_7, window_bounds = array<i64: 16, 128>}]} {
    %c0 = arith.constant 0 : index
    %c0_0 = arith.constant 0 : index
    %0 = vector.load %arg1[%c0, %c0_0] : memref<16x128xbf16, #tpu.memory_space<vmem>>, vector<16x128xbf16>
    %c0_1 = arith.constant 0 : index
    %c0_2 = arith.constant 0 : index
    %1 = vector.load %arg2[%c0_1, %c0_2] : memref<128x128xbf16, #tpu.memory_space<vmem>>, vector<128x128xbf16>
    %c0_3 = arith.constant 0 : index
    %c0_4 = arith.constant 0 : index
    %2 = vector.load %arg3[%c0_3, %c0_4] : memref<1x128xf32, #tpu.memory_space<vmem>>, vector<1x128xf32>
    %cst = arith.constant dense<0.000000e+00> : vector<16x128xf32>
    %3 = tpu.matmul %0, %1, %cst {dimension_numbers = #tpu.dot_dimension_numbers<[1], [0], [0], [1], [0, 0, 1, 1], [], []>} : vector<16x128xbf16>, vector<128x128xbf16>, vector<16x128xf32> -> vector<16x128xf32>
    %4 = vector.broadcast %2 : vector<1x128xf32> to vector<16x128xf32>
    %5 = arith.addf %3, %4 : vector<16x128xf32>
    %cst_5 = arith.constant 0.000000e+00 : f32
    %6 = vector.broadcast %cst_5 : f32 to vector<16x128xf32>
    %7 = arith.maximumf %5, %6 : vector<16x128xf32>
    %8 = arith.truncf %7 : vector<16x128xf32> to vector<16x128xbf16>
    %c0_6 = arith.constant 0 : index
    %c0_7 = arith.constant 0 : index
    %9 = vector.load %arg4[%c0_6, %c0_7] : memref<128x128xbf16, #tpu.memory_space<vmem>>, vector<128x128xbf16>
    %c0_8 = arith.constant 0 : index
    %c0_9 = arith.constant 0 : index
    %10 = vector.load %arg5[%c0_8, %c0_9] : memref<1x128xf32, #tpu.memory_space<vmem>>, vector<1x128xf32>
    %cst_10 = arith.constant dense<0.000000e+00> : vector<16x128xf32>
    %11 = tpu.matmul %8, %9, %cst_10 {dimension_numbers = #tpu.dot_dimension_numbers<[1], [0], [0], [1], [0, 0, 1, 1], [], []>} : vector<16x128xbf16>, vector<128x128xbf16>, vector<16x128xf32> -> vector<16x128xf32>
    %12 = vector.broadcast %10 : vector<1x128xf32> to vector<16x128xf32>
    %13 = arith.addf %11, %12 : vector<16x128xf32>
    %cst_11 = arith.constant 0.000000e+00 : f32
    %14 = vector.broadcast %cst_11 : f32 to vector<16x128xf32>
    %15 = arith.maximumf %13, %14 : vector<16x128xf32>
    %16 = arith.truncf %15 : vector<16x128xf32> to vector<16x128xbf16>
    %c0_12 = arith.constant 0 : index
    %c0_13 = arith.constant 0 : index
    %17 = vector.load %arg6[%c0_12, %c0_13] : memref<128x128xbf16, #tpu.memory_space<vmem>>, vector<128x128xbf16>
    %c0_14 = arith.constant 0 : index
    %c0_15 = arith.constant 0 : index
    %18 = vector.load %arg7[%c0_14, %c0_15] : memref<1x128xf32, #tpu.memory_space<vmem>>, vector<1x128xf32>
    %cst_16 = arith.constant dense<0.000000e+00> : vector<16x128xf32>
    %19 = tpu.matmul %16, %17, %cst_16 {dimension_numbers = #tpu.dot_dimension_numbers<[1], [0], [0], [1], [0, 0, 1, 1], [], []>} : vector<16x128xbf16>, vector<128x128xbf16>, vector<16x128xf32> -> vector<16x128xf32>
    %20 = vector.broadcast %18 : vector<1x128xf32> to vector<16x128xf32>
    %21 = arith.addf %19, %20 : vector<16x128xf32>
    %22 = tpu.iota {dimensions = array<i32: 1>} : vector<16x128xi32>
    %c16_i32 = arith.constant 16 : i32
    %23 = vector.broadcast %c16_i32 : i32 to vector<16x128xi32>
    %24 = arith.cmpi slt, %22, %23 : vector<16x128xi32>
    %cst_17 = arith.constant 0xFF800000 : f32
    %25 = vector.broadcast %cst_17 : f32 to vector<16x128xf32>
    %26 = arith.select %24, %21, %25 : vector<16x128xi1>, vector<16x128xf32>
    %cst_18 = arith.constant dense<0xFF800000> : vector<16xf32>
    %27 = vector.multi_reduction <maximumf>, %26, %cst_18 [1] : vector<16x128xf32> to vector<16xf32>
    %28 = vector.shape_cast %27 : vector<16xf32> to vector<16x1xf32>
    %29 = vector.broadcast %28 : vector<16x1xf32> to vector<16x128xf32>
    %30 = arith.subf %26, %29 : vector<16x128xf32>
    %31 = math.exp %30 : vector<16x128xf32>
    %cst_19 = arith.constant dense<0.000000e+00> : vector<16xf32>
    %32 = vector.multi_reduction <add>, %31, %cst_19 [1] : vector<16x128xf32> to vector<16xf32>
    %33 = vector.shape_cast %32 : vector<16xf32> to vector<16x1xf32>
    %34 = math.log %33 : vector<16x1xf32>
    %35 = vector.broadcast %34 : vector<16x1xf32> to vector<16x128xf32>
    %36 = arith.subf %30, %35 : vector<16x128xf32>
    %c0_20 = arith.constant 0 : index
    %c0_21 = arith.constant 0 : index
    %37 = vector.load %arg8[%c0_20, %c0_21] : memref<16x128xf32, #tpu.memory_space<vmem>>, vector<16x128xf32>
    tpu.vector_store %arg8[%c0_20, %c0_21], %36 {strides = array<i32>} : memref<16x128xf32, #tpu.memory_space<vmem>>, vector<16x128xf32>,
    return
  }
  func.func @transform_0(%arg0: i32) -> (i32, i32) {
    %c0_i32 = arith.constant 0 : i32
    %c0_i32_0 = arith.constant 0 : i32
    return %arg0, %c0_i32 : i32, i32
  }
  func.func @transform_1(%arg0: i32) -> (i32, i32) {
    %c0_i32 = arith.constant 0 : i32
    %c0_i32_0 = arith.constant 0 : i32
    %c0_i32_1 = arith.constant 0 : i32
    return %c0_i32, %c0_i32_0 : i32, i32
  }
  func.func @transform_2(%arg0: i32) -> (i32, i32) {
    %c0_i32 = arith.constant 0 : i32
    %c0_i32_0 = arith.constant 0 : i32
    %c0_i32_1 = arith.constant 0 : i32
    return %c0_i32, %c0_i32_0 : i32, i32
  }
  func.func @transform_3(%arg0: i32) -> (i32, i32) {
    %c0_i32 = arith.constant 0 : i32
    %c0_i32_0 = arith.constant 0 : i32
    %c0_i32_1 = arith.constant 0 : i32
    return %c0_i32, %c0_i32_0 : i32, i32
  }
  func.func @transform_4(%arg0: i32) -> (i32, i32) {
    %c0_i32 = arith.constant 0 : i32
    %c0_i32_0 = arith.constant 0 : i32
    %c0_i32_1 = arith.constant 0 : i32
    return %c0_i32, %c0_i32_0 : i32, i32
  }
  func.func @transform_5(%arg0: i32) -> (i32, i32) {
    %c0_i32 = arith.constant 0 : i32
    %c0_i32_0 = arith.constant 0 : i32
    %c0_i32_1 = arith.constant 0 : i32
    return %c0_i32, %c0_i32_0 : i32, i32
  }
  func.func @transform_6(%arg0: i32) -> (i32, i32) {
    %c0_i32 = arith.constant 0 : i32
    %c0_i32_0 = arith.constant 0 : i32
    %c0_i32_1 = arith.constant 0 : i32
    return %c0_i32, %c0_i32_0 : i32, i32
  }
  func.func @transform_7(%arg0: i32) -> (i32, i32) {
    %c0_i32 = arith.constant 0 : i32
    %c0_i32_0 = arith.constant 0 : i32
    return %arg0, %c0_i32 : i32, i32
  }
}

module attributes {stable_mosaic.version = 11 : i64} {
  func.func @kernel(%arg0: i32, %arg1: memref<16x128xbf16, #tpu.memory_space<vmem>>, %arg2: memref<128x128xbf16, #tpu.memory_space<vmem>>, %arg3: memref<1x128xf32, #tpu.memory_space<vmem>>, %arg4: memref<128x128xbf16, #tpu.memory_space<vmem>>, %arg5: memref<1x128xf32, #tpu.memory_space<vmem>>, %arg6: memref<128x128xbf16, #tpu.memory_space<vmem>>, %arg7: memref<1x128xf32, #tpu.memory_space<vmem>>, %arg8: memref<16x128xf32, #tpu.memory_space<vmem>>) attributes {dimension_semantics = [#tpu.dimension_semantics<parallel>], iteration_bounds = array<i64: 1>, scalar_prefetch = 0 : i64, scratch_operands = 0 : i64, tpu.core_type = #tpu.core_type<tc>, window_params = [{transform_indices = @transform_0, window_bounds = array<i64: 16, 128>}, {pipeline_mode = #tpu.pipeline_mode<synchronous>, transform_indices = @transform_1, window_bounds = array<i64: 128, 128>}, {pipeline_mode = #tpu.pipeline_mode<synchronous>, transform_indices = @transform_2, window_bounds = array<i64: 1, 128>}, {pipeline_mode = #tpu.pipeline_mode<synchronous>, transform_indices = @transform_3, window_bounds = array<i64: 128, 128>}, {pipeline_mode = #tpu.pipeline_mode<synchronous>, transform_indices = @transform_4, window_bounds = array<i64: 1, 128>}, {pipeline_mode = #tpu.pipeline_mode<synchronous>, transform_indices = @transform_5, window_bounds = array<i64: 128, 128>}, {pipeline_mode = #tpu.pipeline_mode<synchronous>, transform_indices = @transform_6, window_bounds = array<i64: 1, 128>}, {transform_indices = @transform_7, window_bounds = array<i64: 16, 128>}]} {
    %c0 = arith.constant 0 : index
    %c0_0 = arith.constant 0 : index
    %0 = vector.load %arg1[%c0, %c0_0] : memref<16x128xbf16, #tpu.memory_space<vmem>>, vector<16x128xbf16>
    %c0_1 = arith.constant 0 : index
    %c0_2 = arith.constant 0 : index
    %1 = vector.load %arg2[%c0_1, %c0_2] : memref<128x128xbf16, #tpu.memory_space<vmem>>, vector<128x128xbf16>
    %c0_3 = arith.constant 0 : index
    %c0_4 = arith.constant 0 : index
    %2 = vector.load %arg3[%c0_3, %c0_4] : memref<1x128xf32, #tpu.memory_space<vmem>>, vector<1x128xf32>
    %cst = arith.constant dense<0.000000e+00> : vector<16x128xf32>
    %3 = tpu.matmul %0, %1, %cst {dimension_numbers = #tpu.dot_dimension_numbers<[1], [0], [0], [1], [0, 0, 1, 1], [], []>} : vector<16x128xbf16>, vector<128x128xbf16>, vector<16x128xf32> -> vector<16x128xf32>
    %4 = vector.broadcast %2 : vector<1x128xf32> to vector<16x128xf32>
    %5 = arith.addf %3, %4 : vector<16x128xf32>
    %cst_5 = arith.constant 0.000000e+00 : f32
    %6 = vector.broadcast %cst_5 : f32 to vector<16x128xf32>
    %7 = arith.maximumf %5, %6 : vector<16x128xf32>
    %8 = arith.truncf %7 : vector<16x128xf32> to vector<16x128xbf16>
    %c0_6 = arith.constant 0 : index
    %c0_7 = arith.constant 0 : index
    %9 = vector.load %arg4[%c0_6, %c0_7] : memref<128x128xbf16, #tpu.memory_space<vmem>>, vector<128x128xbf16>
    %c0_8 = arith.constant 0 : index
    %c0_9 = arith.constant 0 : index
    %10 = vector.load %arg5[%c0_8, %c0_9] : memref<1x128xf32, #tpu.memory_space<vmem>>, vector<1x128xf32>
    %cst_10 = arith.constant dense<0.000000e+00> : vector<16x128xf32>
    %11 = tpu.matmul %8, %9, %cst_10 {dimension_numbers = #tpu.dot_dimension_numbers<[1], [0], [0], [1], [0, 0, 1, 1], [], []>} : vector<16x128xbf16>, vector<128x128xbf16>, vector<16x128xf32> -> vector<16x128xf32>
    %12 = vector.broadcast %10 : vector<1x128xf32> to vector<16x128xf32>
    %13 = arith.addf %11, %12 : vector<16x128xf32>
    %cst_11 = arith.constant 0.000000e+00 : f32
    %14 = vector.broadcast %cst_11 : f32 to vector<16x128xf32>
    %15 = arith.maximumf %13, %14 : vector<16x128xf32>
    %16 = arith.truncf %15 : vector<16x128xf32> to vector<16x128xbf16>
    %c0_12 = arith.constant 0 : index
    %c0_13 = arith.constant 0 : index
    %17 = vector.load %arg6[%c0_12, %c0_13] : memref<128x128xbf16, #tpu.memory_space<vmem>>, vector<128x128xbf16>
    %c0_14 = arith.constant 0 : index
    %c0_15 = arith.constant 0 : index
    %18 = vector.load %arg7[%c0_14, %c0_15] : memref<1x128xf32, #tpu.memory_space<vmem>>, vector<1x128xf32>
    %cst_16 = arith.constant dense<0.000000e+00> : vector<16x128xf32>
    %19 = tpu.matmul %16, %17, %cst_16 {dimension_numbers = #tpu.dot_dimension_numbers<[1], [0], [0], [1], [0, 0, 1, 1], [], []>} : vector<16x128xbf16>, vector<128x128xbf16>, vector<16x128xf32> -> vector<16x128xf32>
    %20 = vector.broadcast %18 : vector<1x128xf32> to vector<16x128xf32>
    %21 = arith.addf %19, %20 : vector<16x128xf32>
    %22 = tpu.iota {dimensions = array<i32: 1>} : vector<16x128xi32>
    %c16_i32 = arith.constant 16 : i32
    %23 = vector.broadcast %c16_i32 : i32 to vector<16x128xi32>
    %24 = arith.cmpi slt, %22, %23 : vector<16x128xi32>
    %cst_17 = arith.constant 0xFF800000 : f32
    %25 = vector.broadcast %cst_17 : f32 to vector<16x128xf32>
    %26 = arith.select %24, %21, %25 : vector<16x128xi1>, vector<16x128xf32>
    %cst_18 = arith.constant dense<0xFF800000> : vector<16xf32>
    %27 = vector.multi_reduction <maximumf>, %26, %cst_18 [1] : vector<16x128xf32> to vector<16xf32>
    %28 = vector.shape_cast %27 : vector<16xf32> to vector<16x1xf32>
    %29 = vector.broadcast %28 : vector<16x1xf32> to vector<16x128xf32>
    %30 = arith.subf %26, %29 : vector<16x128xf32>
    %31 = math.exp %30 : vector<16x128xf32>
    %cst_19 = arith.constant dense<0.000000e+00> : vector<16xf32>
    %32 = vector.multi_reduction <add>, %31, %cst_19 [1] : vector<16x128xf32> to vector<16xf32>
    %33 = vector.shape_cast %32 : vector<16xf32> to vector<16x1xf32>
    %34 = math.log %33 : vector<16x1xf32>
    %35 = vector.broadcast %34 : vector<16x1xf32> to vector<16x128xf32>
    %36 = arith.subf %30, %35 : vector<16x128xf32>
    %c0_20 = arith.constant 0 : index
    %c0_21 = arith.constant 0 : index
    %37 = vector.load %arg8[%c0_20, %c0_21] : memref<16x128xf32, #tpu.memory_space<vmem>>, vector<16x128xf32>
    tpu.vector_store %arg8[%c0_20, %c0_21], %36 {strides = array<i32>} : memref<16x128xf32, #tpu.memory_space<vmem>>, vector<16x128xf32>,
    return
  }
  func.func @transform_0(%arg0: i32) -> (i32, i32) {
    %c0_i32 = arith.constant 0 : i32
    %c0_i32_0 = arith.constant 0 : i32
    return %arg0, %c0_i32 : i32, i32
  }
  func.func @transform_1(%arg0: i32) -> (i32, i32) {
    %c0_i32 = arith.constant 0 : i32
    %c0_i32_0 = arith.constant 0 : i32
    %c0_i32_1 = arith.constant 0 : i32
    return %c0_i32, %c0_i32_0 : i32, i32
  }
  func.func @transform_2(%arg0: i32) -> (i32, i32) {
    %c0_i32 = arith.constant 0 : i32
    %c0_i32_0 = arith.constant 0 : i32
    %c0_i32_1 = arith.constant 0 : i32
    return %c0_i32, %c0_i32_0 : i32, i32
  }
  func.func @transform_3(%arg0: i32) -> (i32, i32) {
    %c0_i32 = arith.constant 0 : i32
    %c0_i32_0 = arith.constant 0 : i32
    %c0_i32_1 = arith.constant 0 : i32
    return %c0_i32, %c0_i32_0 : i32, i32
  }
  func.func @transform_4(%arg0: i32) -> (i32, i32) {
    %c0_i32 = arith.constant 0 : i32
    %c0_i32_0 = arith.constant 0 : i32
    %c0_i32_1 = arith.constant 0 : i32
    return %c0_i32, %c0_i32_0 : i32, i32
  }
  func.func @transform_5(%arg0: i32) -> (i32, i32) {
    %c0_i32 = arith.constant 0 : i32
    %c0_i32_0 = arith.constant 0 : i32
    %c0_i32_1 = arith.constant 0 : i32
    return %c0_i32, %c0_i32_0 : i32, i32
  }
  func.func @transform_6(%arg0: i32) -> (i32, i32) {
    %c0_i32 = arith.constant 0 : i32
    %c0_i32_0 = arith.constant 0 : i32
    %c0_i32_1 = arith.constant 0 : i32
    return %c0_i32, %c0_i32_0 : i32, i32
  }
  func.func @transform_7(%arg0: i32) -> (i32, i32) {
    %c0_i32 = arith.constant 0 : i32
    %c0_i32_0 = arith.constant 0 : i32
    return %arg0, %c0_i32 : i32, i32
  }
}

</mosaic_0001>

<bundles_post_ra>
// kernel: forward.1
= control target key start
LH: loop header
LB: loop body
LE: loop exit
PB: predicated region body
PF: predicated region fallthrough
CT: control target
= control target key end

     0   :  { %12 = vsyncpa [#allocation3], 0  ;;  %s655_s0 = inlined_call_operand.vmem [shape: bf16[16,128], index: 0, kind: input, shape index: {}]   ;;  %s656_s1 = inlined_call_operand.hbm [shape: bf16[128,128], index: 1, kind: input, shape index: {}]   ;;  %s657_s2 = inlined_call_operand.vmem [shape: f32[1,128], index: 2, kind: input, shape index: {}]   ;;  %s658_s3 = inlined_call_operand.hbm [shape: bf16[128,128], index: 3, kind: input, shape index: {}]   ;;  %s659_s4 = inlined_call_operand.vmem [shape: f32[1,128], index: 4, kind: input, shape index: {}]   ;;  %s660_s5 = inlined_call_operand.hbm [shape: bf16[128,128], index: 5, kind: input, shape index: {}]   ;;  %s661_s6 = inlined_call_operand.vmem [shape: f32[1,128], index: 6, kind: input, shape index: {}]   ;;  %s662_s7 = inlined_call_operand.vmem [shape: f32[16,128], index: 7, kind: output, shape index: {}]  }
   0x1   :  { %13 = vsyncpa [#allocation5], 0  ;;  %s35_s26 = sshll.u32 %s658_s3, 4  ;;  %s583_s27 = smov [#allocation4]   ;;  %s36_s26 = int_to_ptr.hbm [resolvable:$true] %s35_s26 }
   0x2   :  { %s37_s28 = sshll.u32 %s583_s27, 4  ;;  %s20_s8 = sshll.u32 %s656_s1, 4  ;;  %s38_s28 = int_to_ptr.vmem [resolvable:$true] %s37_s28  ;;  %s21_s8 = int_to_ptr.hbm [resolvable:$true] %s20_s8 }
   0x3   :  { %s584_s9 = smov 64   ;;  %s585_s10 = smov 4  }
   0x4   :  { %43 = dma.hbm_to_vmem [thread:$0]  %s36_s26, 1024, %s38_s28, [#allocation5], %s584_s9, %s584_s9, %s585_s10  }
   0x5   :  { %s586_s11 = smov [#allocation2]   ;;  %s50_s15 = sshll.u32 %s660_s5, 4  ;;  %s51_s15 = int_to_ptr.hbm [resolvable:$true] %s50_s15 }
   0x6   :  { %s22_s12 = sshll.u32 %s586_s11, 4  ;;  %s587_s3 = smov [#allocation6]   ;;  %s23_s12 = int_to_ptr.vmem [resolvable:$true] %s22_s12 }
   0x7   :  { %28 = dma.hbm_to_vmem [thread:$0]  %s21_s8, 1024, %s23_s12, [#allocation3], %s584_s9, %s584_s9, %s585_s10  }
   0x8   :  { %s52_s16 = sshll.u32 %s587_s3, 4  ;;  %s53_s16 = int_to_ptr.vmem [resolvable:$true] %s52_s16 }
   0x9   :  { %58 = dma.hbm_to_vmem [thread:$0]  %s51_s15, 1024, %s53_s16, [#allocation5], %s584_s9, %s584_s9, %s585_s10  }
   0xa   :  { %579 = dma.done.wait [#allocation3], 1024  }
   0xb   :  { %580 = vsyncadd [#allocation3], 4294966272 }
   0xc   :  { %581 = dma.done.wait [#allocation5], 2048  }
   0xd   :  { %582 = vsyncadd [#allocation5], 4294965248  ;;  %v474_v0 = vld [vmem:[#allocation2 + $0x38] sm:$0xff]  ;;  %v473_v1 = vld [vmem:[#allocation2 + $0x30] sm:$0xff]  ;;  %v333_v41 = vlaneseq }
   0xe   :  { %149 = vmatpush.bf16.msra.mxu0 %v474_v0  ;;  %v482_v2 = vld [vmem:[#allocation4 + $0x38] sm:$0xff]  ;;  %v481_v3 = vld [vmem:[#allocation4 + $0x30] sm:$0xff]  ;;  %v472_v4 = vld [vmem:[#allocation2 + $0x28] sm:$0xff] }
   0xf   :  { %234 = vmatpush.bf16.msra.mxu1 %v482_v2  ;;  %v480_v5 = vld [vmem:[#allocation4 + $0x28] sm:$0xff]  ;;  %v471_v6 = vld [vmem:[#allocation2 + $0x20] sm:$0xff]  ;;  %v470_v8 = vld [vmem:[#allocation2 + $0x18] sm:$0xff]  ;;  %v334_v42 = vand.u32 127, %v333_v41 }
  0x10   :  { %v479_v7 = vld [vmem:[#allocation4 + $0x20] sm:$0xff]  ;;  %v469_v9 = vld [vmem:[#allocation2 + $0x10] sm:$0xff]  ;;  %v468_v10 = vld [vmem:[#allocation2 + $0x8] sm:$0xff] }
  0x11   :  { %v467_v11 = vld [vmem:[#allocation2] sm:$0xff]  ;;  %v478_v13 = vld [vmem:[#allocation4 + $0x18] sm:$0xff]  ;;  %v477_v14 = vld [vmem:[#allocation4 + $0x10] sm:$0xff]  ;;  %vm335_vm0 = vcmp.lt.s32.totalorder %v334_v42, 16 }
  0x12   :  { %150 = vmatpush.bf16.msra.mxu0 %v473_v1  ;;  %v466_v12 = vld [vmem:[%s655_s0] sm:$0xff]  ;;  %v476_v15 = vld [vmem:[#allocation4 + $0x8] sm:$0xff]  ;;  %v490_v17 = vld [vmem:[#allocation6 + $0x38] sm:$0xff] }
  0x13   :  { %235 = vmatpush.bf16.msra.mxu1 %v481_v3  ;;  %v475_v16 = vld [vmem:[#allocation4] sm:$0xff]  ;;  %319 = vmatpush.bf16.msra.mxu2 %v490_v17  ;;  %v489_v18 = vld [vmem:[#allocation6 + $0x30] sm:$0xff]  ;;  %v488_v19 = vld [vmem:[#allocation6 + $0x28] sm:$0xff] }
  0x14   :  { %v487_v20 = vld [vmem:[#allocation6 + $0x20] sm:$0xff]  ;;  %v486_v29 = vld [vmem:[#allocation6 + $0x18] sm:$0xff]  ;;  %v485_v30 = vld [vmem:[#allocation6 + $0x10] sm:$0xff] }
  0x15   :  { %v496_v22 = vld [vmem:[%s657_s2] ss:$0 sm:$0xff]  ;;  %v484_v31 = vld [vmem:[#allocation6 + $0x8] sm:$0xff] }
  0x16   :  { %151 = vmatpush.bf16.msra.mxu0 %v472_v4  ;;  %v483_v32 = vld [vmem:[#allocation6] sm:$0xff] }
  0x17   :  { %236 = vmatpush.bf16.msra.mxu1 %v480_v5  ;;  %320 = vmatpush.bf16.msra.mxu2 %v489_v18  ;;  %v497_v34 = vld [vmem:[%s659_s4] ss:$0 sm:$0xff] }
  0x18   :  { %v498_v43 = vld [vmem:[%s661_s6] ss:$0 sm:$0xff] }
  0x1a   :  { %152 = vmatpush.bf16.msra.mxu0 %v471_v6 }
  0x1b   :  { %237 = vmatpush.bf16.msra.mxu1 %v479_v7  ;;  %321 = vmatpush.bf16.msra.mxu2 %v488_v19 }
  0x1e   :  { %153 = vmatpush.bf16.msra.mxu0 %v470_v8 }
  0x1f   :  { %238 = vmatpush.bf16.msra.mxu1 %v478_v13  ;;  %322 = vmatpush.bf16.msra.mxu2 %v487_v20 }
  0x22   :  { %154 = vmatpush.bf16.msra.mxu0 %v469_v9 }
  0x23   :  { %239 = vmatpush.bf16.msra.mxu1 %v477_v14  ;;  %323 = vmatpush.bf16.msra.mxu2 %v486_v29 }
  0x26   :  { %155 = vmatpush.bf16.msra.mxu0 %v468_v10 }
  0x27   :  { %240 = vmatpush.bf16.msra.mxu1 %v476_v15  ;;  %324 = vmatpush.bf16.msra.mxu2 %v485_v30 }
  0x2a   :  { %156 = vmatpush.bf16.msra.mxu0 %v467_v11 }
  0x2b   :  { %241 = vmatpush.bf16.msra.mxu1 %v475_v16  ;;  %325 = vmatpush.bf16.msra.mxu2 %v484_v31 }
  0x2d   :  { %157 = vmatmul.bf16.vlgmr.msra.gmra.mxu0 %v466_v12 }
  0x2f   :  { %326 = vmatpush.bf16.msra.mxu2 %v483_v32 }
  0xaa   :  { %v158_v21 = vpop.f32.mrf.mxu0 }
  0xab   :  { %v159_v23 = vadd.f32 %v496_v22, %v158_v21 }
  0xad   :  { %v163_v26 = vmax.f32 %v159_v23, 0.0 }
  0xb2   :  { %v160_v24 = vpop.f32.mrf.mxu0 }
  0xb3   :  { %v161_v25 = vadd.f32 %v496_v22, %v160_v24 }
  0xb5   :  { %v164_v27 = vmax.f32 %v161_v25, 0.0 }
  0xb7   :  { %v165_v28 = vpack.c.bf16 %v164_v27, %v163_v26 }
  0xb9   :  { %242 = vmatmul.bf16.vlgmr.msra.gmra.mxu1 %v165_v28 }
 0x136   :  { %v243_v33 = vpop.f32.mrf.mxu1 }
 0x137   :  { %v244_v35 = vadd.f32 %v497_v34, %v243_v33 }
 0x139   :  { %v248_v38 = vmax.f32 %v244_v35, 0.0 }
 0x13e   :  { %v245_v36 = vpop.f32.mrf.mxu1 }
 0x13f   :  { %v246_v37 = vadd.f32 %v497_v34, %v245_v36 }
 0x141   :  { %v249_v39 = vmax.f32 %v246_v37, 0.0 }
 0x143   :  { %v250_v40 = vpack.c.bf16 %v249_v39, %v248_v38 }
 0x145   :  { %327 = vmatmul.bf16.vlgmr.msra.gmra.mxu2 %v250_v40 }
 0x1c8   :  { %v328_v44 = vpop.f32.mrf.mxu2 }
 0x1c9   :  { %v329_v45 = vadd.f32 %v498_v43, %v328_v44 }
 0x1cb   :  { %v336_v46 = vsel %vm335_vm0, %v329_v45, -inf }
 0x1cc   :  { %338 = vmax.xlane.f32.xlu0 %v336_v46 }
 0x1d0   :  { %v330_v47 = vpop.f32.mrf.mxu2 }
 0x1d1   :  { %v331_v48 = vadd.f32 %v498_v43, %v330_v47 }
 0x1d3   :  { %v337_v49 = vsel %vm335_vm0, %v331_v48, -inf }
 0x1d4   :  { %340 = vmax.xlane.f32.xlu0 %v337_v49 }
 0x23f   :  { %v339_v50 = vpop.xlane.xlu0 %338 }
 0x240   :  { %v342_v51 = vsub.f32 %v336_v46, %v339_v50 }
 0x242   :  { %v344_v52 = vmul.f32 1.442695, %v342_v51 }
 0x244   :  { %499 = vpow2.f32 %v344_v52 }
 0x247   :  { %v341_v53 = vpop.xlane.xlu0 %340 }
 0x248   :  { %v343_v54 = vsub.f32 %v337_v49, %v341_v53 }
 0x24a   :  { %v500_v55 = vpop.eup %499  ;;  %v346_v56 = vmul.f32 1.442695, %v343_v54 }
 0x24b   :  { %348 = vadd.xlane.f32.xlu1 %v500_v55 }
 0x24c   :  { %501 = vpow2.f32 %v346_v56 }
 0x252   :  { %v502_v57 = vpop.eup %501 }
 0x253   :  { %350 = vadd.xlane.f32.xlu1 %v502_v57 }
 0x2be   :  { %v349_v58 = vpop.xlane.xlu1 %348 }
 0x2bf   :  { %503 = vlog2.f32 %v349_v58 }
 0x2c5   :  { %v504_v59 = vpop.eup %503 }
 0x2c6   :  { %v353_v60 = vmul.f32 0.6931472, %v504_v59  ;;  %v351_v61 = vpop.xlane.xlu1 %350 }
 0x2c7   :  { %505 = vlog2.f32 %v351_v61 }
 0x2c8   :  { %v356_v62 = vsub.f32 %v342_v51, %v353_v60 }
 0x2ca   :  { %358 = vst [vmem:[%s662_s7] sm:$0xff] %v356_v62 }
 0x2cd   :  { %v506_v63 = vpop.eup %505 }
 0x2ce   :  { %v355_v0 = vmul.f32 0.6931472, %v506_v63 }
 0x2d0   :  { %v357_v1 = vsub.f32 %v343_v54, %v355_v0 }
 0x2d2   :  { %359 = vst [vmem:[%s662_s7 + $0x8] sm:$0xff] %v357_v1 }
 0x2d3   :  { %364 = vsyncpa [#allocation3], 1 }
 0x2d4   :  { %365 = vsyncpa [#allocation5], 1 }

// kernel: forward.1
= control target key start
LH: loop header
LB: loop body
LE: loop exit
PB: predicated region body
PF: predicated region fallthrough
CT: control target
= control target key end

     0   :  { %12 = vsyncpa [#allocation3], 0  ;;  %s655_s0 = inlined_call_operand.vmem [shape: bf16[16,128], index: 0, kind: input, shape index: {}]   ;;  %s656_s1 = inlined_call_operand.hbm [shape: bf16[128,128], index: 1, kind: input, shape index: {}]   ;;  %s657_s2 = inlined_call_operand.vmem [shape: f32[1,128], index: 2, kind: input, shape index: {}]   ;;  %s658_s3 = inlined_call_operand.hbm [shape: bf16[128,128], index: 3, kind: input, shape index: {}]   ;;  %s659_s4 = inlined_call_operand.vmem [shape: f32[1,128], index: 4, kind: input, shape index: {}]   ;;  %s660_s5 = inlined_call_operand.hbm [shape: bf16[128,128], index: 5, kind: input, shape index: {}]   ;;  %s661_s6 = inlined_call_operand.vmem [shape: f32[1,128], index: 6, kind: input, shape index: {}]   ;;  %s662_s7 = inlined_call_operand.vmem [shape: f32[16,128], index: 7, kind: output, shape index: {}]  }
   0x1   :  { %13 = vsyncpa [#allocation5], 0  ;;  %s35_s26 = sshll.u32 %s658_s3, 4  ;;  %s583_s27 = smov [#allocation4]   ;;  %s36_s26 = int_to_ptr.hbm [resolvable:$true] %s35_s26 }
   0x2   :  { %s37_s28 = sshll.u32 %s583_s27, 4  ;;  %s20_s8 = sshll.u32 %s656_s1, 4  ;;  %s38_s28 = int_to_ptr.vmem [resolvable:$true] %s37_s28  ;;  %s21_s8 = int_to_ptr.hbm [resolvable:$true] %s20_s8 }
   0x3   :  { %s584_s9 = smov 64   ;;  %s585_s10 = smov 4  }
   0x4   :  { %43 = dma.hbm_to_vmem [thread:$0]  %s36_s26, 1024, %s38_s28, [#allocation5], %s584_s9, %s584_s9, %s585_s10  }
   0x5   :  { %s586_s11 = smov [#allocation2]   ;;  %s50_s15 = sshll.u32 %s660_s5, 4  ;;  %s51_s15 = int_to_ptr.hbm [resolvable:$true] %s50_s15 }
   0x6   :  { %s22_s12 = sshll.u32 %s586_s11, 4  ;;  %s587_s3 = smov [#allocation6]   ;;  %s23_s12 = int_to_ptr.vmem [resolvable:$true] %s22_s12 }
   0x7   :  { %28 = dma.hbm_to_vmem [thread:$0]  %s21_s8, 1024, %s23_s12, [#allocation3], %s584_s9, %s584_s9, %s585_s10  }
   0x8   :  { %s52_s16 = sshll.u32 %s587_s3, 4  ;;  %s53_s16 = int_to_ptr.vmem [resolvable:$true] %s52_s16 }
   0x9   :  { %58 = dma.hbm_to_vmem [thread:$0]  %s51_s15, 1024, %s53_s16, [#allocation5], %s584_s9, %s584_s9, %s585_s10  }
   0xa   :  { %579 = dma.done.wait [#allocation3], 1024  }
   0xb   :  { %580 = vsyncadd [#allocation3], 4294966272 }
   0xc   :  { %581 = dma.done.wait [#allocation5], 2048  }
   0xd   :  { %582 = vsyncadd [#allocation5], 4294965248  ;;  %v474_v0 = vld [vmem:[#allocation2 + $0x38] sm:$0xff]  ;;  %v473_v1 = vld [vmem:[#allocation2 + $0x30] sm:$0xff]  ;;  %v333_v41 = vlaneseq }
   0xe   :  { %149 = vmatpush.bf16.msra.mxu0 %v474_v0  ;;  %v482_v2 = vld [vmem:[#allocation4 + $0x38] sm:$0xff]  ;;  %v481_v3 = vld [vmem:[#allocation4 + $0x30] sm:$0xff]  ;;  %v472_v4 = vld [vmem:[#allocation2 + $0x28] sm:$0xff] }
   0xf   :  { %234 = vmatpush.bf16.msra.mxu1 %v482_v2  ;;  %v480_v5 = vld [vmem:[#allocation4 + $0x28] sm:$0xff]  ;;  %v471_v6 = vld [vmem:[#allocation2 + $0x20] sm:$0xff]  ;;  %v470_v8 = vld [vmem:[#allocation2 + $0x18] sm:$0xff]  ;;  %v334_v42 = vand.u32 127, %v333_v41 }
  0x10   :  { %v479_v7 = vld [vmem:[#allocation4 + $0x20] sm:$0xff]  ;;  %v469_v9 = vld [vmem:[#allocation2 + $0x10] sm:$0xff]  ;;  %v468_v10 = vld [vmem:[#allocation2 + $0x8] sm:$0xff] }
  0x11   :  { %v467_v11 = vld [vmem:[#allocation2] sm:$0xff]  ;;  %v478_v13 = vld [vmem:[#allocation4 + $0x18] sm:$0xff]  ;;  %v477_v14 = vld [vmem:[#allocation4 + $0x10] sm:$0xff]  ;;  %vm335_vm0 = vcmp.lt.s32.totalorder %v334_v42, 16 }
  0x12   :  { %150 = vmatpush.bf16.msra.mxu0 %v473_v1  ;;  %v466_v12 = vld [vmem:[%s655_s0] sm:$0xff]  ;;  %v476_v15 = vld [vmem:[#allocation4 + $0x8] sm:$0xff]  ;;  %v490_v17 = vld [vmem:[#allocation6 + $0x38] sm:$0xff] }
  0x13   :  { %235 = vmatpush.bf16.msra.mxu1 %v481_v3  ;;  %v475_v16 = vld [vmem:[#allocation4] sm:$0xff]  ;;  %319 = vmatpush.bf16.msra.mxu2 %v490_v17  ;;  %v489_v18 = vld [vmem:[#allocation6 + $0x30] sm:$0xff]  ;;  %v488_v19 = vld [vmem:[#allocation6 + $0x28] sm:$0xff] }
  0x14   :  { %v487_v20 = vld [vmem:[#allocation6 + $0x20] sm:$0xff]  ;;  %v486_v29 = vld [vmem:[#allocation6 + $0x18] sm:$0xff]  ;;  %v485_v30 = vld [vmem:[#allocation6 + $0x10] sm:$0xff] }
  0x15   :  { %v496_v22 = vld [vmem:[%s657_s2] ss:$0 sm:$0xff]  ;;  %v484_v31 = vld [vmem:[#allocation6 + $0x8] sm:$0xff] }
  0x16   :  { %151 = vmatpush.bf16.msra.mxu0 %v472_v4  ;;  %v483_v32 = vld [vmem:[#allocation6] sm:$0xff] }
  0x17   :  { %236 = vmatpush.bf16.msra.mxu1 %v480_v5  ;;  %320 = vmatpush.bf16.msra.mxu2 %v489_v18  ;;  %v497_v34 = vld [vmem:[%s659_s4] ss:$0 sm:$0xff] }
  0x18   :  { %v498_v43 = vld [vmem:[%s661_s6] ss:$0 sm:$0xff] }
  0x1a   :  { %152 = vmatpush.bf16.msra.mxu0 %v471_v6 }
  0x1b   :  { %237 = vmatpush.bf16.msra.mxu1 %v479_v7  ;;  %321 = vmatpush.bf16.msra.mxu2 %v488_v19 }
  0x1e   :  { %153 = vmatpush.bf16.msra.mxu0 %v470_v8 }
  0x1f   :  { %238 = vmatpush.bf16.msra.mxu1 %v478_v13  ;;  %322 = vmatpush.bf16.msra.mxu2 %v487_v20 }
  0x22   :  { %154 = vmatpush.bf16.msra.mxu0 %v469_v9 }
  0x23   :  { %239 = vmatpush.bf16.msra.mxu1 %v477_v14  ;;  %323 = vmatpush.bf16.msra.mxu2 %v486_v29 }
  0x26   :  { %155 = vmatpush.bf16.msra.mxu0 %v468_v10 }
  0x27   :  { %240 = vmatpush.bf16.msra.mxu1 %v476_v15  ;;  %324 = vmatpush.bf16.msra.mxu2 %v485_v30 }
  0x2a   :  { %156 = vmatpush.bf16.msra.mxu0 %v467_v11 }
  0x2b   :  { %241 = vmatpush.bf16.msra.mxu1 %v475_v16  ;;  %325 = vmatpush.bf16.msra.mxu2 %v484_v31 }
  0x2d   :  { %157 = vmatmul.bf16.vlgmr.msra.gmra.mxu0 %v466_v12 }
  0x2f   :  { %326 = vmatpush.bf16.msra.mxu2 %v483_v32 }
  0xaa   :  { %v158_v21 = vpop.f32.mrf.mxu0 }
  0xab   :  { %v159_v23 = vadd.f32 %v496_v22, %v158_v21 }
  0xad   :  { %v163_v26 = vmax.f32 %v159_v23, 0.0 }
  0xb2   :  { %v160_v24 = vpop.f32.mrf.mxu0 }
  0xb3   :  { %v161_v25 = vadd.f32 %v496_v22, %v160_v24 }
  0xb5   :  { %v164_v27 = vmax.f32 %v161_v25, 0.0 }
  0xb7   :  { %v165_v28 = vpack.c.bf16 %v164_v27, %v163_v26 }
  0xb9   :  { %242 = vmatmul.bf16.vlgmr.msra.gmra.mxu1 %v165_v28 }
 0x136   :  { %v243_v33 = vpop.f32.mrf.mxu1 }
 0x137   :  { %v244_v35 = vadd.f32 %v497_v34, %v243_v33 }
 0x139   :  { %v248_v38 = vmax.f32 %v244_v35, 0.0 }
 0x13e   :  { %v245_v36 = vpop.f32.mrf.mxu1 }
 0x13f   :  { %v246_v37 = vadd.f32 %v497_v34, %v245_v36 }
 0x141   :  { %v249_v39 = vmax.f32 %v246_v37, 0.0 }
 0x143   :  { %v250_v40 = vpack.c.bf16 %v249_v39, %v248_v38 }
 0x145   :  { %327 = vmatmul.bf16.vlgmr.msra.gmra.mxu2 %v250_v40 }
 0x1c8   :  { %v328_v44 = vpop.f32.mrf.mxu2 }
 0x1c9   :  { %v329_v45 = vadd.f32 %v498_v43, %v328_v44 }
 0x1cb   :  { %v336_v46 = vsel %vm335_vm0, %v329_v45, -inf }
 0x1cc   :  { %338 = vmax.xlane.f32.xlu0 %v336_v46 }
 0x1d0   :  { %v330_v47 = vpop.f32.mrf.mxu2 }
 0x1d1   :  { %v331_v48 = vadd.f32 %v498_v43, %v330_v47 }
 0x1d3   :  { %v337_v49 = vsel %vm335_vm0, %v331_v48, -inf }
 0x1d4   :  { %340 = vmax.xlane.f32.xlu0 %v337_v49 }
 0x23f   :  { %v339_v50 = vpop.xlane.xlu0 %338 }
 0x240   :  { %v342_v51 = vsub.f32 %v336_v46, %v339_v50 }
 0x242   :  { %v344_v52 = vmul.f32 1.442695, %v342_v51 }
 0x244   :  { %499 = vpow2.f32 %v344_v52 }
 0x247   :  { %v341_v53 = vpop.xlane.xlu0 %340 }
 0x248   :  { %v343_v54 = vsub.f32 %v337_v49, %v341_v53 }
 0x24a   :  { %v500_v55 = vpop.eup %499  ;;  %v346_v56 = vmul.f32 1.442695, %v343_v54 }
 0x24b   :  { %348 = vadd.xlane.f32.xlu1 %v500_v55 }
 0x24c   :  { %501 = vpow2.f32 %v346_v56 }
 0x252   :  { %v502_v57 = vpop.eup %501 }
 0x253   :  { %350 = vadd.xlane.f32.xlu1 %v502_v57 }
 0x2be   :  { %v349_v58 = vpop.xlane.xlu1 %348 }
 0x2bf   :  { %503 = vlog2.f32 %v349_v58 }
 0x2c5   :  { %v504_v59 = vpop.eup %503 }
 0x2c6   :  { %v353_v60 = vmul.f32 0.6931472, %v504_v59  ;;  %v351_v61 = vpop.xlane.xlu1 %350 }
 0x2c7   :  { %505 = vlog2.f32 %v351_v61 }
 0x2c8   :  { %v356_v62 = vsub.f32 %v342_v51, %v353_v60 }
 0x2ca   :  { %358 = vst [vmem:[%s662_s7] sm:$0xff] %v356_v62 }
 0x2cd   :  { %v506_v63 = vpop.eup %505 }
 0x2ce   :  { %v355_v0 = vmul.f32 0.6931472, %v506_v63 }
 0x2d0   :  { %v357_v1 = vsub.f32 %v343_v54, %v355_v0 }
 0x2d2   :  { %359 = vst [vmem:[%s662_s7 + $0x8] sm:$0xff] %v357_v1 }
 0x2d3   :  { %364 = vsyncpa [#allocation3], 1 }
 0x2d4   :  { %365 = vsyncpa [#allocation5], 1 }

</bundles_post_ra>
